<compile_context>
chip_gen: v7x
topology: tpu7x:2x2x1
jax: 0.10.0
libtpu: 0.0.40
codegen_flags: <defaults>
</compile_context>

<pallas_src>
import functools

import jax
import jax.numpy as jnp
from jax.experimental import pallas as pl
from jax.experimental.pallas import tpu as pltpu


def _round_up(x, m):
    return ((x + m - 1) // m) * m


def _cdiv(a, b):
    return -(-a // b)


def _tpu_caps():
    """(per-core VMEM bytes, TensorCores per chip) with conservative fallbacks."""
    vmem = 64 * 1024 * 1024          # assume the smallest (v7x) if the query fails
    cores = 1
    try:
        info = pltpu.get_tpu_info()
        vmem = int(getattr(info, "vmem_capacity_bytes", vmem))
        for name in ("num_cores", "core_count", "num_tensorcores",
                     "tensorcores_per_chip"):
            val = getattr(info, name, None)
            if val:
                cores = int(val)
                break
    except Exception:
        pass
    return vmem, cores


def _est_vmem_bytes(tm, embed_dim, enc_cols, act_isz, w_isz, enc_buffers=2):
    resident = 3 * embed_dim * embed_dim * w_isz + 8 * embed_dim * 4
    stream = enc_buffers * tm * enc_cols * act_isz        # streaming enc blocks
    stream += 2 * tm * embed_dim * act_isz                # output blocks
    stream += 2 * tm * 128 * act_isz                      # adv blocks (lane-padded)
    temps = 6 * tm * embed_dim * 4                        # f32 intermediates
    return resident + stream + temps


def _pick_row_tile(m_rows, embed_dim, enc_cols, act_isz, w_isz, align,
                   vmem_budget, tm_max, target_block_bytes=2 * 1024 * 1024):
    """Byte-targeted row tile: ~2 MiB streaming enc block, clamped to the
    generation-aware VMEM budget and the problem size."""
    tm = max(align, target_block_bytes // max(1, enc_cols * act_isz))
    tm = min(tm, tm_max, _round_up(m_rows, align))
    tm = max(align, (tm // align) * align)
    while tm > align and _est_vmem_bytes(tm, embed_dim, enc_cols,
                                         act_isz, w_isz) > vmem_budget:
        tm = max(align, ((tm // 2) // align) * align)
    return tm


def _rl_gated_decoder_kernel(
    adv_ref,       # (TM, 1)          per-row advantage
    enc_ref,       # (TM, E) or (TM, 2E)  even-step features (fast / fallback)
    vecs_ref,      # (8, E) f32       [g_scale; g_shift; b_state; b1; b2; 0;0;0]
    w_state_ref,   # (E, E)           state_mlp weight (in, out)
    w1_ref,        # (E, E)           final_mlp[0] weight
    w2_ref,        # (E, E)           final_mlp[2] weight
    out_ref,       # (TM, E)
):
    f32 = jnp.float32
    E = out_ref.shape[-1]
    cdt = w_state_ref.dtype          # MXU operand dtype (bf16-native if params bf16)

    # Fast path: the enc block already holds only the even-step features.
    # Fallback (E not a multiple of 128): block holds the [even | odd] pair.
    enc = enc_ref[...] if enc_ref.shape[-1] == E else enc_ref[:, :E]
    enc = enc.astype(cdt)

    g_scale = vecs_ref[0:1, :]       # f32 (1, E): w_adv @ w_ctx
    g_shift = vecs_ref[1:2, :]       # f32 (1, E): b_adv @ w_ctx + b_ctx
    b_state = vecs_ref[2:3, :]
    b1 = vecs_ref[3:4, :]
    b2 = vecs_ref[4:5, :]

    # state_mlp on the even-timestep features (f32 accumulation on the MXU).
    state = jnp.dot(enc, w_state_ref[...], preferred_element_type=f32) + b_state

    # adv_embed + context_mlp folded into a per-row affine map -> VPU/EUP only.
    adv = adv_ref[...].astype(f32)                          # (TM, 1)
    gate = jax.nn.sigmoid(adv * g_scale + g_shift)          # (TM, E)

    h = (state * gate).astype(cdt)

    # final_mlp: Linear -> ReLU -> Linear.
    h1 = jnp.maximum(
        jnp.dot(h, w1_ref[...], preferred_element_type=f32) + b1, 0.0
    ).astype(cdt)
    out = jnp.dot(h1, w2_ref[...], preferred_element_type=f32) + b2
    out_ref[...] = out.astype(out_ref.dtype)


@functools.partial(jax.jit, static_argnames=("tm_max", "compute_dtype"))
def rl_gated_decoder(agent_advs, enc_src, params, *, tm_max=2048,
                     compute_dtype=None):
    """agent_advs: (B, L, 1); enc_src: (B, S, E) with S in {2L-1, 2L}."""
    B, L, _ = agent_advs.shape
    _, S, E = enc_src.shape
    if S == 2 * L - 1:
        # TODO(synk): avoid this full re-materialization of enc_src (odd-S
        # edge case) via a strided/tail DMA instead of an XLA pad.
        enc_src = jnp.pad(enc_src, ((0, 0), (0, 1), (0, 0)))
    elif S != 2 * L:
        raise ValueError(f"enc_src[:, 0::2] must have length L={L}; got S={S}")

    (w_adv, b_adv, w_state, b_state, w_ctx, b_ctx, w1, b1, w2, b2) = params
    f32 = jnp.float32

    if compute_dtype is not None:    # opt-in lower-precision MXU/stream path
        w_state = w_state.astype(compute_dtype)
        w1 = w1.astype(compute_dtype)
        w2 = w2.astype(compute_dtype)

    # Fold adv_embed + context_mlp[0] (rank-1 per row) into two (1, E) vectors:
    #   gate_pre = adv * (w_adv @ w_ctx) + (b_adv @ w_ctx + b_ctx)
    g_scale = jnp.dot(w_adv.astype(f32), w_ctx.astype(f32)).reshape(1, E)
    g_shift = (jnp.dot(b_adv.astype(f32).reshape(1, E), w_ctx.astype(f32))
               + b_ctx.astype(f32).reshape(1, E))

    # Pack all small constants into one resident, sublane-dense (8, E) block.
    vecs = jnp.concatenate(
        [g_scale, g_shift,
         b_state.astype(f32).reshape(1, E),
         b1.astype(f32).reshape(1, E),
         b2.astype(f32).reshape(1, E),
         jnp.zeros((3, E), f32)], axis=0)

    # Free, layout-preserving view: row r = [enc[b, 2p, :], enc[b, 2p+1, :]].
    M = B * L
    enc_pairs = enc_src.reshape(M, 2 * E)
    adv_rows = agent_advs.reshape(M, 1)

    act_isz = jnp.dtype(enc_src.dtype).itemsize
    w_isz = jnp.dtype(w_state.dtype).itemsize
    align = 8 * max(1, 4 // act_isz)          # f32: 8, bf16: 16, int8: 32

    # When E is lane-aligned, only the even-step half of each row pair is DMA'd.
    lane_aligned = (E % 128 == 0)
    enc_cols = E if lane_aligned else 2 * E

    vmem_cap, num_cores = _tpu_caps()
    vmem_budget = int(vmem_cap * 0.55)
    vmem_limit = int(vmem_cap * 0.625)

    tm = _pick_row_tile(M, E, enc_cols, act_isz, w_isz, align, vmem_budget, tm_max)
    n_steps = _cdiv(M, tm)
    if num_cores > 1 and n_steps % num_cores:
        n_steps = _round_up(n_steps, num_cores)      # balance TensorCores (v7x)
    tm = min(tm, max(align, _round_up(_cdiv(M, n_steps), align)))
    M_pad = n_steps * tm

    if M_pad != M:
        # TODO(synk): replace with a masked tail block to avoid this copy.
        adv_rows = jnp.pad(adv_rows, ((0, M_pad - M), (0, 0)))
        enc_pairs = jnp.pad(enc_pairs, ((0, M_pad - M), (0, 0)))

    # Constant-index weights/vecs: keep resident, single-buffered.
    resident = pl.Buffered(1)

    def const_spec(shape):
        return pl.BlockSpec(shape, lambda i: (0, 0), pipeline_mode=resident)

    # Deeper pipeline on the streaming enc input when VMEM headroom exists.
    enc_buffers = 2
    if (n_steps >= 3 and
            _est_vmem_bytes(tm, E, enc_cols, act_isz, w_isz, 3) <= vmem_budget):
        enc_buffers = 3
    if enc_buffers == 3:
        enc_spec = pl.BlockSpec((tm, enc_cols), lambda i: (i, 0),
                                pipeline_mode=pl.Buffered(3))
    else:
        enc_spec = pl.BlockSpec((tm, enc_cols), lambda i: (i, 0))

    cost = pl.CostEstimate(
        flops=6 * M * E * E,
        transcendentals=M * E,
        bytes_accessed=(M * (2 * E + 1) * act_isz
                        + 3 * E * E * w_isz + 8 * E * 4),
    )

    out_rows = pl.pallas_call(
        _rl_gated_decoder_kernel,
        out_shape=jax.ShapeDtypeStruct((M_pad, E), enc_src.dtype),
        grid=(n_steps,),
        in_specs=[
            pl.BlockSpec((tm, 1), lambda i: (i, 0)),   # adv rows
            enc_spec,                                  # even-step enc rows
            const_spec((8, E)),                        # packed gate/bias vecs
            const_spec((E, E)),                        # w_state
            const_spec((E, E)),                        # w1
            const_spec((E, E)),                        # w2
        ],
        out_specs=pl.BlockSpec((tm, E), lambda i: (i, 0)),
        compiler_params=pltpu.CompilerParams(
            dimension_semantics=("parallel",),
            vmem_limit_bytes=vmem_limit,
        ),
        cost_estimate=cost,
    )(adv_rows, enc_pairs, vecs, w_state, w1, w2)

    return out_rows[:M].reshape(B, L, E)


def init_params(key, embed_dim):
    """PyTorch nn.Linear-style init; weights stored pre-transposed (in, out)."""
    def linear(k, fan_in, fan_out):
        kw, kb = jax.random.split(k)
        bound = 1.0 / jnp.sqrt(float(fan_in))
        w = jax.random.uniform(kw, (fan_in, fan_out), jnp.float32, -bound, bound)
        b = jax.random.uniform(kb, (1, fan_out), jnp.float32, -bound, bound)
        return w, b

    keys = jax.random.split(key, 5)
    w_adv, b_adv = linear(keys[0], 1, embed_dim)              # adv_embed
    w_state, b_state = linear(keys[1], embed_dim, embed_dim)  # state_mlp
    w_ctx, b_ctx = linear(keys[2], embed_dim, embed_dim)      # context_mlp[0]
    w1, b1 = linear(keys[3], embed_dim, embed_dim)            # final_mlp[0]
    w2, b2 = linear(keys[4], embed_dim, embed_dim)            # final_mlp[2]
    return (w_adv, b_adv, w_state, b_state, w_ctx, b_ctx, w1, b1, w2, b2)


def reference_forward(agent_advs, enc_src, params):
    """Pure-JAX reference mirroring the PyTorch forward exactly (f32)."""
    (w_adv, b_adv, w_state, b_state, w_ctx, b_ctx, w1, b1, w2, b2) = params
    f32 = jnp.float32
    adv_emb = agent_advs.astype(f32) @ w_adv.astype(f32) + b_adv.astype(f32)[0]
    out = enc_src.astype(f32)[:, 0::2]
    out = out @ w_state.astype(f32) + b_state.astype(f32)[0]
    gate = jax.nn.sigmoid(adv_emb @ w_ctx.astype(f32) + b_ctx.astype(f32)[0])
    out = out * gate
    out = jnp.maximum(out @ w1.astype(f32) + b1.astype(f32)[0], 0.0)
    return out @ w2.astype(f32) + b2.astype(f32)[0]


def reference_forward_factored_gate(agent_advs, enc_src, params):
    """Same as reference_forward but with the gate factored like the kernel."""
    (w_adv, b_adv, w_state, b_state, w_ctx, b_ctx, w1, b1, w2, b2) = params
    f32 = jnp.float32
    g_scale = jnp.dot(w_adv.astype(f32), w_ctx.astype(f32))
    g_shift = jnp.dot(b_adv.astype(f32), w_ctx.astype(f32)) + b_ctx.astype(f32)
    gate = jax.nn.sigmoid(agent_advs.astype(f32) * g_scale[0] + g_shift[0])
    out = enc_src.astype(f32)[:, 0::2]
    out = out @ w_state.astype(f32) + b_state.astype(f32)[0]
    out = out * gate
    out = jnp.maximum(out @ w1.astype(f32) + b1.astype(f32)[0], 0.0)
    return out @ w2.astype(f32) + b2.astype(f32)[0]


if __name__ == "__main__":
    key = jax.random.PRNGKey(0)
    k1, k2, k3, k4, k5, k6, k7 = jax.random.split(key, 7)

    # --- Test 1: small spec-like shapes, E=32 (non-lane-aligned fallback path).
    B, L, E = 2, 8, 32
    S = 2 * L
    adv = jax.random.normal(k1, (B, L, 1), jnp.float32)
    enc = jax.random.normal(k2, (B, S, E), jnp.float32)
    params = init_params(k3, E)

    out = jax.block_until_ready(rl_gated_decoder(adv, enc, params))
    assert out.shape == (B, L, E)
    ref = reference_forward(adv, enc, params)
    ref_fact = reference_forward_factored_gate(adv, enc, params)
    assert jnp.allclose(out, ref_fact, atol=1e-4, rtol=1e-4), "mismatch (factored ref)"
    assert jnp.allclose(out, ref, atol=2e-3, rtol=2e-3), "mismatch vs reference"

    # --- Test 2: ragged row count + odd S (= 2L - 1).
    B2, L2 = 3, 5
    adv2 = jax.random.normal(k4, (B2, L2, 1), jnp.float32)
    enc2 = jax.random.normal(k5, (B2, 2 * L2 - 1, E), jnp.float32)
    out2 = jax.block_until_ready(rl_gated_decoder(adv2, enc2, params))
    assert out2.shape == (B2, L2, E)
    assert jnp.allclose(out2, reference_forward(adv2, enc2, params),
                        atol=2e-3, rtol=2e-3), "mismatch (ragged case)"

    # --- Test 3: bf16 params + activations (f32 accumulation, loose tolerance).
    params_bf16 = jax.tree_util.tree_map(lambda x: x.astype(jnp.bfloat16), params)
    out_bf16 = jax.block_until_ready(
        rl_gated_decoder(adv.astype(jnp.bfloat16),
                         enc.astype(jnp.bfloat16), params_bf16))
    assert out_bf16.dtype == jnp.bfloat16
    assert float(jnp.max(jnp.abs(out_bf16.astype(jnp.float32) - ref))) < 0.15

    # --- Test 4: lane-aligned E=128 (even-only enc DMA fast path).
    B3, L3, E3 = 2, 8, 128
    adv3 = jax.random.normal(k6, (B3, L3, 1), jnp.float32)
    enc3 = jax.random.normal(k7, (B3, 2 * L3, E3), jnp.float32)
    params3 = init_params(jax.random.PRNGKey(1), E3)
    out3 = jax.block_until_ready(rl_gated_decoder(adv3, enc3, params3))
    assert out3.shape == (B3, L3, E3)
    ref3 = reference_forward(adv3, enc3, params3)
    ref3_fact = reference_forward_factored_gate(adv3, enc3, params3)
    assert jnp.allclose(out3, ref3_fact, atol=2e-3, rtol=2e-3), "mismatch (E=128, factored)"
    assert jnp.allclose(out3, ref3, atol=5e-3, rtol=5e-3), "mismatch (E=128)"

    print("KERNEL_OK")
</pallas_src>

<mosaic_0001>
module attributes {stable_mosaic.version = 11 : i64} {
  func.func @_rl_gated_decoder_kernel(%arg0: i32, %arg1: memref<16x1xf32, #tpu.memory_space<vmem>>, %arg2: memref<16x64xf32, #tpu.memory_space<vmem>>, %arg3: memref<8x32xf32, #tpu.memory_space<vmem>>, %arg4: memref<32x32xf32, #tpu.memory_space<vmem>>, %arg5: memref<32x32xf32, #tpu.memory_space<vmem>>, %arg6: memref<32x32xf32, #tpu.memory_space<vmem>>, %arg7: memref<16x32xf32, #tpu.memory_space<vmem>>) attributes {dimension_semantics = [#tpu.dimension_semantics<parallel>], iteration_bounds = array<i64: 1>, scalar_prefetch = 0 : i64, scratch_operands = 0 : i64, tpu.core_type = #tpu.core_type<tc>, window_params = [{transform_indices = @transform_0, window_bounds = array<i64: 16, 1>}, {transform_indices = @transform_1, window_bounds = array<i64: 16, 64>}, {pipeline_mode = #tpu.pipeline_mode<synchronous>, transform_indices = @transform_2, window_bounds = array<i64: 8, 32>}, {pipeline_mode = #tpu.pipeline_mode<synchronous>, transform_indices = @transform_3, window_bounds = array<i64: 32, 32>}, {pipeline_mode = #tpu.pipeline_mode<synchronous>, transform_indices = @transform_4, window_bounds = array<i64: 32, 32>}, {pipeline_mode = #tpu.pipeline_mode<synchronous>, transform_indices = @transform_5, window_bounds = array<i64: 32, 32>}, {transform_indices = @transform_6, window_bounds = array<i64: 16, 32>}]} {
    %c0 = arith.constant 0 : index
    %c0_0 = arith.constant 0 : index
    %0 = vector.load %arg2[%c0, %c0_0] : memref<16x64xf32, #tpu.memory_space<vmem>>, vector<16x32xf32>
    %c0_1 = arith.constant 0 : index
    %c0_2 = arith.constant 0 : index
    %1 = vector.load %arg3[%c0_1, %c0_2] : memref<8x32xf32, #tpu.memory_space<vmem>>, vector<1x32xf32>
    %c1 = arith.constant 1 : index
    %c0_3 = arith.constant 0 : index
    %2 = vector.load %arg3[%c1, %c0_3] : memref<8x32xf32, #tpu.memory_space<vmem>>, vector<1x32xf32>
    %c2 = arith.constant 2 : index
    %c0_4 = arith.constant 0 : index
    %3 = vector.load %arg3[%c2, %c0_4] : memref<8x32xf32, #tpu.memory_space<vmem>>, vector<1x32xf32>
    %c3 = arith.constant 3 : index
    %c0_5 = arith.constant 0 : index
    %4 = vector.load %arg3[%c3, %c0_5] : memref<8x32xf32, #tpu.memory_space<vmem>>, vector<1x32xf32>
    %c4 = arith.constant 4 : index
    %c0_6 = arith.constant 0 : index
    %5 = vector.load %arg3[%c4, %c0_6] : memref<8x32xf32, #tpu.memory_space<vmem>>, vector<1x32xf32>
    %c0_7 = arith.constant 0 : index
    %c0_8 = arith.constant 0 : index
    %6 = vector.load %arg4[%c0_7, %c0_8] : memref<32x32xf32, #tpu.memory_space<vmem>>, vector<32x32xf32>
    %cst = arith.constant dense<0.000000e+00> : vector<16x32xf32>
    %7 = tpu.matmul %0, %6, %cst {dimension_numbers = #tpu.dot_dimension_numbers<[1], [0], [0], [1], [0, 0, 1, 1], [], []>} : vector<16x32xf32>, vector<32x32xf32>, vector<16x32xf32> -> vector<16x32xf32>
    %8 = vector.broadcast %3 : vector<1x32xf32> to vector<16x32xf32>
    %9 = arith.addf %7, %8 : vector<16x32xf32>
    %c0_9 = arith.constant 0 : index
    %c0_10 = arith.constant 0 : index
    %10 = vector.load %arg1[%c0_9, %c0_10] : memref<16x1xf32, #tpu.memory_space<vmem>>, vector<16x1xf32>
    %11 = vector.broadcast %10 : vector<16x1xf32> to vector<16x32xf32>
    %12 = vector.broadcast %1 : vector<1x32xf32> to vector<16x32xf32>
    %13 = arith.mulf %11, %12 : vector<16x32xf32>
    %14 = vector.broadcast %2 : vector<1x32xf32> to vector<16x32xf32>
    %15 = arith.addf %13, %14 : vector<16x32xf32>
    %16 = arith.negf %15 : vector<16x32xf32>
    %17 = math.exp %16 : vector<16x32xf32>
    %cst_11 = arith.constant 1.000000e+00 : f32
    %18 = vector.broadcast %cst_11 : f32 to vector<16x32xf32>
    %19 = arith.addf %18, %17 : vector<16x32xf32>
    %20 = arith.divf %18, %19 : vector<16x32xf32>
    %21 = arith.mulf %9, %20 : vector<16x32xf32>
    %c0_12 = arith.constant 0 : index
    %c0_13 = arith.constant 0 : index
    %22 = vector.load %arg5[%c0_12, %c0_13] : memref<32x32xf32, #tpu.memory_space<vmem>>, vector<32x32xf32>
    %cst_14 = arith.constant dense<0.000000e+00> : vector<16x32xf32>
    %23 = tpu.matmul %21, %22, %cst_14 {dimension_numbers = #tpu.dot_dimension_numbers<[1], [0], [0], [1], [0, 0, 1, 1], [], []>} : vector<16x32xf32>, vector<32x32xf32>, vector<16x32xf32> -> vector<16x32xf32>
    %24 = vector.broadcast %4 : vector<1x32xf32> to vector<16x32xf32>
    %25 = arith.addf %23, %24 : vector<16x32xf32>
    %cst_15 = arith.constant 0.000000e+00 : f32
    %26 = vector.broadcast %cst_15 : f32 to vector<16x32xf32>
    %27 = arith.maximumf %25, %26 : vector<16x32xf32>
    %c0_16 = arith.constant 0 : index
    %c0_17 = arith.constant 0 : index
    %28 = vector.load %arg6[%c0_16, %c0_17] : memref<32x32xf32, #tpu.memory_space<vmem>>, vector<32x32xf32>
    %cst_18 = arith.constant dense<0.000000e+00> : vector<16x32xf32>
    %29 = tpu.matmul %27, %28, %cst_18 {dimension_numbers = #tpu.dot_dimension_numbers<[1], [0], [0], [1], [0, 0, 1, 1], [], []>} : vector<16x32xf32>, vector<32x32xf32>, vector<16x32xf32> -> vector<16x32xf32>
    %30 = vector.broadcast %5 : vector<1x32xf32> to vector<16x32xf32>
    %31 = arith.addf %29, %30 : vector<16x32xf32>
    %c0_19 = arith.constant 0 : index
    %c0_20 = arith.constant 0 : index
    %32 = vector.load %arg7[%c0_19, %c0_20] : memref<16x32xf32, #tpu.memory_space<vmem>>, vector<16x32xf32>
    tpu.vector_store %arg7[%c0_19, %c0_20], %31 {strides = array<i32>} : memref<16x32xf32, #tpu.memory_space<vmem>>, vector<16x32xf32>,
    return
  }
  func.func @transform_0(%arg0: i32) -> (i32, i32) {
    %c0_i32 = arith.constant 0 : i32
    %c0_i32_0 = arith.constant 0 : i32
    return %arg0, %c0_i32 : i32, i32
  }
  func.func @transform_1(%arg0: i32) -> (i32, i32) {
    %c0_i32 = arith.constant 0 : i32
    %c0_i32_0 = arith.constant 0 : i32
    return %arg0, %c0_i32 : i32, i32
  }
  func.func @transform_2(%arg0: i32) -> (i32, i32) {
    %c0_i32 = arith.constant 0 : i32
    %c0_i32_0 = arith.constant 0 : i32
    %c0_i32_1 = arith.constant 0 : i32
    return %c0_i32, %c0_i32_0 : i32, i32
  }
  func.func @transform_3(%arg0: i32) -> (i32, i32) {
    %c0_i32 = arith.constant 0 : i32
    %c0_i32_0 = arith.constant 0 : i32
    %c0_i32_1 = arith.constant 0 : i32
    return %c0_i32, %c0_i32_0 : i32, i32
  }
  func.func @transform_4(%arg0: i32) -> (i32, i32) {
    %c0_i32 = arith.constant 0 : i32
    %c0_i32_0 = arith.constant 0 : i32
    %c0_i32_1 = arith.constant 0 : i32
    return %c0_i32, %c0_i32_0 : i32, i32
  }
  func.func @transform_5(%arg0: i32) -> (i32, i32) {
    %c0_i32 = arith.constant 0 : i32
    %c0_i32_0 = arith.constant 0 : i32
    %c0_i32_1 = arith.constant 0 : i32
    return %c0_i32, %c0_i32_0 : i32, i32
  }
  func.func @transform_6(%arg0: i32) -> (i32, i32) {
    %c0_i32 = arith.constant 0 : i32
    %c0_i32_0 = arith.constant 0 : i32
    return %arg0, %c0_i32 : i32, i32
  }
}

</mosaic_0001>

<bundles_post_ra>
// kernel: rl_gated_decoder.1
= control target key start
LH: loop header
LB: loop body
LE: loop exit
PB: predicated region body
PF: predicated region fallthrough
CT: control target
= control target key end

     0   :  { %vm39_vm0 = vcmask 261120   ;;  %v482_v6 = vmov 0   ;;  %s604_s0 = inlined_call_operand.vmem [shape: f32[16,1], index: 0, kind: input, shape index: {}]   ;;  %s605_s1 = inlined_call_operand.vmem [shape: f32[16,64], index: 1, kind: input, shape index: {}]   ;;  %s606_s2 = inlined_call_operand.vmem [shape: f32[8,32], index: 2, kind: input, shape index: {}]   ;;  %s607_s3 = inlined_call_operand.vmem [shape: f32[32,32], index: 3, kind: input, shape index: {}]   ;;  %s608_s4 = inlined_call_operand.vmem [shape: f32[32,32], index: 4, kind: input, shape index: {}]   ;;  %s609_s5 = inlined_call_operand.vmem [shape: f32[32,32], index: 5, kind: input, shape index: {}]   ;;  %s610_s6 = inlined_call_operand.hbm [shape: f32[16,32], index: 6, kind: output, shape index: {}]  }
   0x1   :  { %v31_v0 = vld [vmem:[%s607_s3] sm:$0xff]  ;;  %v32_v1 = vld [vmem:[%s607_s3 + $0x8] sm:$0xff]  ;;  %v33_v2 = vld [vmem:[%s607_s3 + $0x10] sm:$0xff]  ;;  %449 = vset.pattern.permute.xlu0 %v482_v6 }
   0x2   :  { %v421_v3 = vpack.c.bf16 %v32_v1, %v31_v0  ;;  %v34_v4 = vld [vmem:[%s607_s3 + $0x18] sm:$0xff]  ;;  %v24_v5 = vld [vmem:[%s605_s1] sm:$0xff] }
   0x3   :  { %v425_v7 = vpack.c.bf16 %v34_v4, %v33_v2  ;;  %396 = vmatprep.mubr.msk.f32.mxu0 %vm39_vm0, %v24_v5  ;;  %v121_v8 = vld [vmem:[%s604_s0] sm:$0xff] }
   0x4   :  { %422 = vmatprep.subr.bf16.mxu0 %v421_v3  ;;  %125 = vperm.xlu0 %449, %v121_v8  }
   0x5   :  { %11 = vsyncpa [#allocation3], 0  ;;  %424 = vmatpush3.bf16.msra.mxu0 %v421_v3  ;;  %v122_v9 = vld [vmem:[%s604_s0 + $0x8] sm:$0xff]  ;;  %v159_v11 = vld [vmem:[%s608_s4] sm:$0xff] }
   0x6   :  { %426 = vmatprep.subr.bf16.mxu0 %v425_v7  ;;  %v25_v10 = vld [vmem:[%s605_s1 + $0x8] sm:$0xff]  ;;  %v161_v14 = vld [vmem:[%s608_s4 + $0x10] sm:$0xff]  ;;  %v162_v15 = vld [vmem:[%s608_s4 + $0x18] sm:$0xff] }
   0x7   :  { %v160_v12 = vld [vmem:[%s608_s4 + $0x8] sm:$0xff]  ;;  %v433_v16 = vpack.c.bf16 %v162_v15, %v161_v14  ;;  %v250_v17 = vld [vmem:[%s609_s5] sm:$0xff]  ;;  %v252_v43 = vld [vmem:[%s609_s5 + $0x10] sm:$0xff] }
   0x8   :  { %130 = vperm.xlu0 %449, %v122_v9   ;;  %v429_v13 = vpack.c.bf16 %v160_v12, %v159_v11  ;;  %v251_v18 = vld [vmem:[%s609_s5 + $0x8] sm:$0xff]  ;;  %v360_v21 = vld [vmem:[%s606_s2] ss:$0 sm:$0xff]  ;;  %v361_v24 = vld [vmem:[%s606_s2 + $0x1] ss:$0 sm:$0xff] }
   0x9   :  { %428 = vmatpush3.bf16.msra.mxu0 %v425_v7  ;;  %v437_v19 = vpack.c.bf16 %v251_v18, %v250_v17  ;;  %v357_v34 = vld [vmem:[%s606_s2 + $0x2] ss:$0 sm:$0xff]  ;;  %v253_v44 = vld [vmem:[%s609_s5 + $0x18] sm:$0xff]  ;;  %v364_v46 = vld [vmem:[%s606_s2 + $0x3] ss:$0 sm:$0xff]  ;;  %s483_s5 = smov [#allocation2]  }
   0xa   :  { %430 = vmatprep.subr.bf16.mxu1 %v429_v13  ;;  %v441_v45 = vpack.c.bf16 %v253_v44, %v252_v43  ;;  %v367_v53 = vld [vmem:[%s606_s2 + $0x4] ss:$0 sm:$0xff]  ;;  %s346_s3 = sshll.u32 %s483_s5, 4  ;;  %s347_s3 = int_to_ptr.vmem [resolvable:$true] %s346_s3 }
   0xb   :  { %432 = vmatpush3.bf16.msra.mxu1 %v429_v13  ;;  %438 = vmatprep.subr.bf16.mxu0 %v437_v19  ;;  %s458_s11 = scalar_lea.vmem %s347_s3, 256  ;;  %p463_p1 = scmp.lt.s32.totalorder %s347_s3, %s347_s3 }
   0xc   :  { %397 = vmatmul.mubr.msk.f32.vlgmr.msra.gmra.mrb[0].mxu0 %vm39_vm0, %v25_v10  ;;  %434 = vmatprep.subr.bf16.mxu1 %v433_v16  ;;  %p459_p0 = scmp.ne.s32.totalorder %s347_s3, %s458_s11  ;;  %p464_p2 = scmp.lt.s32.totalorder %s458_s11, %s458_s11 }
   0xd   :  { %440 = vmatpush3.bf16.msra.mxu0 %v437_v19 }
   0xe   :  { %442 = vmatprep.subr.bf16.mxu0 %v441_v45  ;;  %p465_p3 = por %p464_p2, %p463_p1 }
   0xf   :  { %436 = vmatpush3.bf16.msra.mxu1 %v433_v16 }
  0x10   :  { %p466_p4 = pnand %p465_p3, %p459_p0 }
  0x11   :  { %444 = vmatpush3.bf16.msra.mxu0 %v441_v45 }
  0x83   :  { %v126_v20 = vpop.permute.xlu0 %125 }
  0x84   :  { %v137_v23 = vmul.f32 %v360_v21, %v126_v20 }
  0x86   :  { %v143_v26 = vadd.f32 %v361_v24, %v137_v23 }
  0x87   :  { %v131_v22 = vpop.permute.xlu0 %130 }
  0x88   :  { %v138_v25 = vmul.f32 %v360_v21, %v131_v22  ;;  %v362_v28 = vmul.f32 -1.442695, %v143_v26 }
  0x8a   :  { %v144_v27 = vadd.f32 %v361_v24, %v138_v25  ;;  %450 = vpow2.f32 %v362_v28 }
  0x8c   :  { %v363_v29 = vmul.f32 -1.442695, %v144_v27 }
  0x8e   :  { %452 = vpow2.f32 %v363_v29 }
  0x94   :  { %v451_v30 = vpop.eup %450 }
  0x95   :  { %v151_v32 = vadd.f32 1.0, %v451_v30 }
  0x97   :  { %454 = vrcp.f32 %v151_v32 }
  0x98   :  { %v453_v31 = vpop.eup %452 }
  0x99   :  { %v152_v33 = vadd.f32 1.0, %v453_v31 }
  0x9b   :  { %456 = vrcp.f32 %v152_v33 }
  0xa1   :  { %v455_v39 = vpop.eup %454 }
  0xa5   :  { %v457_v40 = vpop.eup %456 }
  0xdf   :  { %v398_v35 = vpop.f32.mrb[0].mxu0 }
  0xe0   :  { %v118_v36 = vadd.f32 %v398_v35, %v357_v34  ;;  %v112_v37 = vpop.f32.mrb[1].mxu0 }
  0xe1   :  { %v113_v38 = vadd.f32 %v357_v34, %v112_v37 }
  0xe2   :  { %v158_v42 = vmul.f32 %v457_v40, %v118_v36 }
  0xe3   :  { %v157_v41 = vmul.f32 %v455_v39, %v113_v38 }
  0xe5   :  { %407 = vmatprep.mubr.msk.f32.mxu1 %vm39_vm0, %v157_v41 }
  0xe6   :  { %408 = vmatmul.mubr.msk.f32.vlgmr.msra.gmra.mrb[0].mxu1 %vm39_vm0, %v158_v42 }
 0x1b9   :  { %v409_v47 = vpop.f32.mrb[0].mxu1 }
 0x1ba   :  { %v245_v48 = vadd.f32 %v409_v47, %v364_v46  ;;  %v239_v49 = vpop.f32.mrb[1].mxu1 }
 0x1bb   :  { %v240_v50 = vadd.f32 %v364_v46, %v239_v49 }
 0x1bc   :  { %v249_v52 = vmax.f32 %v245_v48, 0.0 }
 0x1bd   :  { %v248_v51 = vmax.f32 %v240_v50, 0.0 }
 0x1bf   :  { %418 = vmatprep.mubr.msk.f32.mxu0 %vm39_vm0, %v248_v51 }
 0x1c0   :  { %419 = vmatmul.mubr.msk.f32.vlgmr.msra.gmra.mrb[2].mxu0 %vm39_vm0, %v249_v52 }
 0x293   :  { %v420_v54 = vpop.f32.mrb[2].mxu0 }
 0x294   :  { %v336_v55 = vadd.f32 %v420_v54, %v367_v53  ;;  %v330_v56 = vpop.f32.mrb[3].mxu0 }
 0x295   :  { %v331_v57 = vadd.f32 %v367_v53, %v330_v56 }
 0x296   :  { %340 = vst.msk [vmem:[#allocation2 + $0x8] sm:$0xff] %vm39_vm0, %v336_v55 }
 0x297   :  { %339 = vst.msk [vmem:[#allocation2] sm:$0xff] %vm39_vm0, %v331_v57 }
 0x298   :  { %469 = shalt.err (!%p466_p4)
}
 0x299   :  { %s470_s13 = scalar_lea.hbm %s610_s6, 256 }
 0x29a   :  { %p471_p5 = scmp.ne.s32.totalorder %s610_s6, %s470_s13  ;;  %p474_p6 = scmp.lt.u32.totalorder %s470_s13, %s610_s6 }
 0x29c   :  { %p476_p7 = pnand %p474_p6, %p471_p5 }
 0x29e   :  { %479 = shalt.err (!%p476_p7)
}
 0x29f   :  { %s484_s17 = smov 128   ;;  %s485_s18 = smov 8  }
 0x2a0   :  { %352 = dma.vmem_to_hbm [thread:$0]  %s347_s3, 256, %s610_s6, [#allocation3], %s484_s17, %s484_s17, %s485_s18  }
 0x2a1   :  { %480 = dma.done.wait [#allocation3], 256  }
 0x2a2   :  { %481 = vsyncadd [#allocation3], 4294967040 }
 0x2a3   :  { %356 = vsyncpa [#allocation3], 1 }

</bundles_post_ra>
